<compile_context>
chip_gen: v7x
topology: tpu7x:2x2x1
jax: 0.10.0
libtpu: 0.0.40
codegen_flags: <defaults>
</compile_context>

<pallas_src>
import jax
import jax.numpy as jnp
from jax import lax
from jax.experimental import pallas as pl
from jax.experimental.pallas import tpu as pltpu

_LANE = 128


def _round_up(n, m):
    return ((n + m - 1) // m) * m


def _nbytes(a):
    return int(a.size) * a.dtype.itemsize


# ----------------------------------------------------------------------------
# Kernel
# ----------------------------------------------------------------------------
def _deeponet_kernel(x_ref, pts_ref, w_b1_ref, w_t1_ref, w_hid_ref, w_out_ref,
                     b_hid_ref, b_out_ref, out_ref):
    """All refs are full-array VMEM residents (no grid).

      x_ref    : [B, S]        f32   branch input (unpadded)
      pts_ref  : [P, 2]        f32   trunk input (unpadded)
      w_b1_ref : [S, H]        f32   branch layer-1 weight
      w_t1_ref : [2, H]        f32   trunk  layer-1 weight
      w_hid_ref: [2, 2, H, H]  bf16  layers 2,3 weights (axis0: 0=branch 1=trunk)
      w_out_ref: [2, H, M]     bf16  layer 4 weights
      b_hid_ref: [2, 3, H]     f32   biases of layers 1,2,3
      b_out_ref: [2, M]        f32   bias of layer 4
      out_ref  : [B, P]        f32 (or bf16)
    """

    def first_layer(inp, w_ref, bias):
        # Tiny fan-in (num_start_points for branch, 2 for trunk): a handful of
        # f32 VPU broadcast-FMAs beats a zero-padded 128-deep MXU contraction
        # and lets the input arrive unpadded.  MXU fallback for large fan-in.
        k_dim = inp.shape[1]
        if k_dim <= 32:
            w = w_ref[...]                       # [k_dim, H] f32, one load
            h = inp[:, 0:1] * w[0:1, :]
            for k in range(1, k_dim):
                h = h + inp[:, k:k + 1] * w[k:k + 1, :]
        else:
            h = jnp.dot(inp.astype(jnp.bfloat16),
                        w_ref[...].astype(jnp.bfloat16),
                        preferred_element_type=jnp.float32)
        return jnp.maximum(h + bias, 0.0)

    def tail(h, net):
        # Layers 2, 3: [rows, H] @ [H, H], bf16 inputs / f32 MXU accumulation.
        for l in range(2):
            h = jnp.dot(h.astype(jnp.bfloat16), w_hid_ref[net, l],
                        preferred_element_type=jnp.float32)
            h = jnp.maximum(h + b_hid_ref[net, l + 1:l + 2, :], 0.0)
        # Layer 4: [rows, H] @ [H, M], no ReLU.
        h = jnp.dot(h.astype(jnp.bfloat16), w_out_ref[net],
                    preferred_element_type=jnp.float32)
        return h + b_out_ref[net:net + 1, :]

    branch = tail(first_layer(x_ref[...], w_b1_ref, b_hid_ref[0, 0:1, :]), 0)
    trunk = tail(first_layer(pts_ref[...], w_t1_ref, b_hid_ref[1, 0:1, :]), 1)

    # sum over the medium dim == branch @ trunk.T.  Contract the LAST axis of
    # both operands (MXU transposed-RHS path, no materialized transpose) and
    # keep it in f32: at M=128 this matmul is tiny and f32 removes the extra
    # bf16 rounding flagged in review.
    out = lax.dot_general(branch, trunk,
                          dimension_numbers=(((1,), (1,)), ((), ())),
                          preferred_element_type=jnp.float32)
    out_ref[...] = out.astype(out_ref.dtype)


# ----------------------------------------------------------------------------
# Wrapper
# ----------------------------------------------------------------------------
def deeponet_forward(x, points, packed_params, out_dtype=jnp.float32):
    """x: [B, num_start_points] f32, points: [P, 2] f32 -> [B, P]."""
    w_b1, w_t1, w_hid, w_out, b_hid, b_out = packed_params
    B, S = x.shape
    P, _ = points.shape
    H = w_b1.shape[1]
    M = w_out.shape[2]

    flops = 2 * (B * S * H + P * 2 * H
                 + (B + P) * (2 * H * H + H * M)
                 + B * P * M)
    bytes_accessed = (sum(_nbytes(a) for a in
                          (x, points, w_b1, w_t1, w_hid, w_out, b_hid, b_out))
                      + B * P * jnp.dtype(out_dtype).itemsize)

    # TODO(synk): when many (x, points) problems are evaluated back-to-back,
    # fold them into one pallas_call with a grid over the problem batch and
    # constant index_maps for the weight arrays (weights stay VMEM-resident
    # across grid steps); for large B*P add a "parallel" grid over P with
    # tiles sized for v7x's 64 MiB VMEM / v5e's 16 MiB scoped default.
    return pl.pallas_call(
        _deeponet_kernel,
        out_shape=jax.ShapeDtypeStruct((B, P), out_dtype),
        in_specs=[pl.BlockSpec(memory_space=pltpu.MemorySpace.VMEM)] * 8,
        out_specs=pl.BlockSpec(memory_space=pltpu.MemorySpace.VMEM),
        cost_estimate=pl.CostEstimate(flops=flops, transcendentals=0,
                                      bytes_accessed=bytes_accessed),
    )(x, points, w_b1, w_t1, w_hid, w_out, b_hid, b_out)


# ----------------------------------------------------------------------------
# Parameter init (mimics torch.nn.Linear default init) + packing
# ----------------------------------------------------------------------------
def _init_linear(key, fan_in, fan_out):
    # U(-1/sqrt(fan_in), 1/sqrt(fan_in)); weight stored [in, out].
    kw, kb = jax.random.split(key)
    bound = 1.0 / (fan_in ** 0.5)
    w = jax.random.uniform(kw, (fan_in, fan_out), jnp.float32, -bound, bound)
    b = jax.random.uniform(kb, (fan_out,), jnp.float32, -bound, bound)
    return w, b


def init_deeponet_params(key, num_start_points, medium_size, hidden=100):
    dims_branch = [(num_start_points, hidden), (hidden, hidden),
                   (hidden, hidden), (hidden, medium_size)]
    dims_trunk = [(2, hidden), (hidden, hidden),
                  (hidden, hidden), (hidden, medium_size)]
    keys = jax.random.split(key, 8)
    branch = [_init_linear(k, fi, fo) for k, (fi, fo) in zip(keys[:4], dims_branch)]
    trunk = [_init_linear(k, fi, fo) for k, (fi, fo) in zip(keys[4:], dims_trunk)]
    return branch, trunk


def pack_params(branch, trunk):
    """Pad hidden/medium widths to 128 lanes and pack 16 tensors into 6 arrays.

    Layer-1 weights keep their real (tiny) fan-in and stay f32 (VPU FMA path in
    the kernel -> no zero-padded K=128 contraction, no padded input DMA).
    Everything the MXU touches is bf16; biases stay f32.
    # TODO(synk): optionally fuse branch+trunk hidden layers into 256-wide
    # block-diagonal bf16 weights on v6e/v7x (2x256^2 MXU) once row counts grow;
    # keep this K=128 per-net layout on v5e (4x128^2 MXU).
    """
    hidden = branch[0][0].shape[1]
    medium = branch[3][0].shape[1]
    H = _round_up(hidden, _LANE)
    M = _round_up(medium, _LANE)

    def pad2(w, r, c):
        return jnp.zeros((r, c), jnp.float32).at[:w.shape[0], :w.shape[1]].set(w)

    def pad1(b, c):
        return jnp.zeros((c,), jnp.float32).at[:b.shape[0]].set(b)

    w_b1 = pad2(branch[0][0], branch[0][0].shape[0], H)            # [S, H] f32
    w_t1 = pad2(trunk[0][0], trunk[0][0].shape[0], H)              # [2, H] f32
    w_hid = jnp.stack([
        jnp.stack([pad2(branch[1][0], H, H), pad2(branch[2][0], H, H)]),
        jnp.stack([pad2(trunk[1][0], H, H), pad2(trunk[2][0], H, H)]),
    ]).astype(jnp.bfloat16)                                        # [2, 2, H, H]
    w_out = jnp.stack([pad2(branch[3][0], H, M),
                       pad2(trunk[3][0], H, M)]).astype(jnp.bfloat16)  # [2, H, M]
    b_hid = jnp.stack([
        jnp.stack([pad1(branch[l][1], H) for l in range(3)]),
        jnp.stack([pad1(trunk[l][1], H) for l in range(3)]),
    ])                                                             # [2, 3, H] f32
    b_out = jnp.stack([pad1(branch[3][1], M),
                       pad1(trunk[3][1], M)])                      # [2, M] f32
    return (w_b1, w_t1, w_hid, w_out, b_hid, b_out)


# ----------------------------------------------------------------------------
# References
# ----------------------------------------------------------------------------
def _reference_forward_f32(x, points, branch, trunk):
    """Pure-f32 reference, exactly the PyTorch forward math."""
    def mlp(h, layers):
        for i, (w, b) in enumerate(layers):
            h = h @ w + b
            if i < 3:
                h = jnp.maximum(h, 0.0)
        return h
    br = mlp(x, branch)                                       # [B, M]
    tr = mlp(points, trunk)                                   # [P, M]
    return jnp.sum(br[:, None, :] * tr[None, :, :], axis=2)  # [B, P]


def _reference_forward_kernel_math(x, points, packed_params):
    """Mirrors the kernel's dtype/padding choices in plain jnp."""
    w_b1, w_t1, w_hid, w_out, b_hid, b_out = packed_params

    def first(inp, w, b):
        h = jnp.dot(inp, w, precision=lax.Precision.HIGHEST)
        return jnp.maximum(h + b, 0.0)

    def tail(h, net):
        for l in range(2):
            h = jnp.dot(h.astype(jnp.bfloat16), w_hid[net, l],
                        preferred_element_type=jnp.float32)
            h = jnp.maximum(h + b_hid[net, l + 1:l + 2, :], 0.0)
        h = jnp.dot(h.astype(jnp.bfloat16), w_out[net],
                    preferred_element_type=jnp.float32)
        return h + b_out[net:net + 1, :]

    br = tail(first(x, w_b1, b_hid[0, 0:1, :]), 0)
    tr = tail(first(points, w_t1, b_hid[1, 0:1, :]), 1)
    return lax.dot_general(br, tr, dimension_numbers=(((1,), (1,)), ((), ())),
                           precision=lax.Precision.HIGHEST,
                           preferred_element_type=jnp.float32)


# TODO(synk): forward_eval's min-max rescaling depends on external data
# (DarcyFlowCircle outputs a/b); only forward() is implemented here.

if __name__ == "__main__":
    num_start_points = 8
    medium_size = 64
    B = 4       # batch of input functions
    P = 16      # number of query points

    key = jax.random.PRNGKey(0)
    kx, kp, kparam = jax.random.split(key, 3)

    x = jax.random.normal(kx, (B, num_start_points), jnp.float32)
    points = jax.random.uniform(kp, (P, 2), jnp.float32)

    branch, trunk = init_deeponet_params(kparam, num_start_points, medium_size)
    packed = pack_params(branch, trunk)

    fwd = jax.jit(deeponet_forward)
    out = jax.block_until_ready(fwd(x, points, packed))
    assert out.shape == (B, P)

    # Check vs. a jnp mirror of the kernel's math (same bf16 casting).
    ref_mirror = _reference_forward_kernel_math(x, points, packed)
    assert jnp.allclose(out, ref_mirror, atol=1e-2, rtol=1e-2), \
        "mismatch vs kernel-math jnp reference"

    # Semantic check vs. the original f32 PyTorch math (bf16 hidden weights
    # widen the error, so tolerance is loosened accordingly).
    ref_f32 = _reference_forward_f32(x, points, branch, trunk)
    assert jnp.allclose(out, ref_f32, atol=5e-2, rtol=5e-2), \
        "mismatch vs f32 reference"

    print("KERNEL_OK")
</pallas_src>

<mosaic_0001>
module attributes {stable_mosaic.version = 11 : i64} {
  func.func @_deeponet_kernel(%arg0: memref<4x8xf32, #tpu.memory_space<vmem>>, %arg1: memref<16x2xf32, #tpu.memory_space<vmem>>, %arg2: memref<8x128xf32, #tpu.memory_space<vmem>>, %arg3: memref<2x128xf32, #tpu.memory_space<vmem>>, %arg4: memref<2x2x128x128xbf16, #tpu.memory_space<vmem>>, %arg5: memref<2x128x128xbf16, #tpu.memory_space<vmem>>, %arg6: memref<2x3x128xf32, #tpu.memory_space<vmem>>, %arg7: memref<2x128xf32, #tpu.memory_space<vmem>>, %arg8: memref<4x16xf32, #tpu.memory_space<vmem>>) attributes {dimension_semantics = [], scalar_prefetch = 0 : i64, scratch_operands = 0 : i64, tpu.core_type = #tpu.core_type<tc>} {
    %c0 = arith.constant 0 : index
    %c0_0 = arith.constant 0 : index
    %0 = vector.load %arg0[%c0, %c0_0] : memref<4x8xf32, #tpu.memory_space<vmem>>, vector<4x8xf32>
    %c0_1 = arith.constant 0 : index
    %c0_2 = arith.constant 0 : index
    %c0_3 = arith.constant 0 : index
    %1 = vector.load %arg6[%c0_1, %c0_2, %c0_3] : memref<2x3x128xf32, #tpu.memory_space<vmem>>, vector<1x1x128xf32>
    %2 = vector.shape_cast %1 : vector<1x1x128xf32> to vector<1x128xf32>
    %c0_4 = arith.constant 0 : index
    %c0_5 = arith.constant 0 : index
    %3 = vector.load %arg2[%c0_4, %c0_5] : memref<8x128xf32, #tpu.memory_space<vmem>>, vector<8x128xf32>
    %4 = vector.extract_strided_slice %0 {offsets = [0, 0], sizes = [4, 1], strides = [1, 1]} : vector<4x8xf32> to vector<4x1xf32>
    %5 = vector.extract_strided_slice %3 {offsets = [0, 0], sizes = [1, 128], strides = [1, 1]} : vector<8x128xf32> to vector<1x128xf32>
    %6 = vector.broadcast %4 : vector<4x1xf32> to vector<4x128xf32>
    %7 = vector.broadcast %5 : vector<1x128xf32> to vector<4x128xf32>
    %8 = arith.mulf %6, %7 : vector<4x128xf32>
    %9 = vector.extract_strided_slice %0 {offsets = [0, 1], sizes = [4, 1], strides = [1, 1]} : vector<4x8xf32> to vector<4x1xf32>
    %10 = vector.extract_strided_slice %3 {offsets = [1, 0], sizes = [1, 128], strides = [1, 1]} : vector<8x128xf32> to vector<1x128xf32>
    %11 = vector.broadcast %9 : vector<4x1xf32> to vector<4x128xf32>
    %12 = vector.broadcast %10 : vector<1x128xf32> to vector<4x128xf32>
    %13 = arith.mulf %11, %12 : vector<4x128xf32>
    %14 = arith.addf %8, %13 : vector<4x128xf32>
    %15 = vector.extract_strided_slice %0 {offsets = [0, 2], sizes = [4, 1], strides = [1, 1]} : vector<4x8xf32> to vector<4x1xf32>
    %16 = vector.extract_strided_slice %3 {offsets = [2, 0], sizes = [1, 128], strides = [1, 1]} : vector<8x128xf32> to vector<1x128xf32>
    %17 = vector.broadcast %15 : vector<4x1xf32> to vector<4x128xf32>
    %18 = vector.broadcast %16 : vector<1x128xf32> to vector<4x128xf32>
    %19 = arith.mulf %17, %18 : vector<4x128xf32>
    %20 = arith.addf %14, %19 : vector<4x128xf32>
    %21 = vector.extract_strided_slice %0 {offsets = [0, 3], sizes = [4, 1], strides = [1, 1]} : vector<4x8xf32> to vector<4x1xf32>
    %22 = vector.extract_strided_slice %3 {offsets = [3, 0], sizes = [1, 128], strides = [1, 1]} : vector<8x128xf32> to vector<1x128xf32>
    %23 = vector.broadcast %21 : vector<4x1xf32> to vector<4x128xf32>
    %24 = vector.broadcast %22 : vector<1x128xf32> to vector<4x128xf32>
    %25 = arith.mulf %23, %24 : vector<4x128xf32>
    %26 = arith.addf %20, %25 : vector<4x128xf32>
    %27 = vector.extract_strided_slice %0 {offsets = [0, 4], sizes = [4, 1], strides = [1, 1]} : vector<4x8xf32> to vector<4x1xf32>
    %28 = vector.extract_strided_slice %3 {offsets = [4, 0], sizes = [1, 128], strides = [1, 1]} : vector<8x128xf32> to vector<1x128xf32>
    %29 = vector.broadcast %27 : vector<4x1xf32> to vector<4x128xf32>
    %30 = vector.broadcast %28 : vector<1x128xf32> to vector<4x128xf32>
    %31 = arith.mulf %29, %30 : vector<4x128xf32>
    %32 = arith.addf %26, %31 : vector<4x128xf32>
    %33 = vector.extract_strided_slice %0 {offsets = [0, 5], sizes = [4, 1], strides = [1, 1]} : vector<4x8xf32> to vector<4x1xf32>
    %34 = vector.extract_strided_slice %3 {offsets = [5, 0], sizes = [1, 128], strides = [1, 1]} : vector<8x128xf32> to vector<1x128xf32>
    %35 = vector.broadcast %33 : vector<4x1xf32> to vector<4x128xf32>
    %36 = vector.broadcast %34 : vector<1x128xf32> to vector<4x128xf32>
    %37 = arith.mulf %35, %36 : vector<4x128xf32>
    %38 = arith.addf %32, %37 : vector<4x128xf32>
    %39 = vector.extract_strided_slice %0 {offsets = [0, 6], sizes = [4, 1], strides = [1, 1]} : vector<4x8xf32> to vector<4x1xf32>
    %40 = vector.extract_strided_slice %3 {offsets = [6, 0], sizes = [1, 128], strides = [1, 1]} : vector<8x128xf32> to vector<1x128xf32>
    %41 = vector.broadcast %39 : vector<4x1xf32> to vector<4x128xf32>
    %42 = vector.broadcast %40 : vector<1x128xf32> to vector<4x128xf32>
    %43 = arith.mulf %41, %42 : vector<4x128xf32>
    %44 = arith.addf %38, %43 : vector<4x128xf32>
    %45 = vector.extract_strided_slice %0 {offsets = [0, 7], sizes = [4, 1], strides = [1, 1]} : vector<4x8xf32> to vector<4x1xf32>
    %46 = vector.extract_strided_slice %3 {offsets = [7, 0], sizes = [1, 128], strides = [1, 1]} : vector<8x128xf32> to vector<1x128xf32>
    %47 = vector.broadcast %45 : vector<4x1xf32> to vector<4x128xf32>
    %48 = vector.broadcast %46 : vector<1x128xf32> to vector<4x128xf32>
    %49 = arith.mulf %47, %48 : vector<4x128xf32>
    %50 = arith.addf %44, %49 : vector<4x128xf32>
    %51 = vector.broadcast %2 : vector<1x128xf32> to vector<4x128xf32>
    %52 = arith.addf %50, %51 : vector<4x128xf32>
    %cst = arith.constant 0.000000e+00 : f32
    %53 = vector.broadcast %cst : f32 to vector<4x128xf32>
    %54 = arith.maximumf %52, %53 : vector<4x128xf32>
    %55 = arith.truncf %54 : vector<4x128xf32> to vector<4x128xbf16>
    %c0_6 = arith.constant 0 : index
    %c0_7 = arith.constant 0 : index
    %c0_8 = arith.constant 0 : index
    %c0_9 = arith.constant 0 : index
    %56 = vector.load %arg4[%c0_6, %c0_7, %c0_8, %c0_9] : memref<2x2x128x128xbf16, #tpu.memory_space<vmem>>, vector<1x1x128x128xbf16>
    %57 = vector.shape_cast %56 : vector<1x1x128x128xbf16> to vector<128x128xbf16>
    %cst_10 = arith.constant dense<0.000000e+00> : vector<4x128xf32>
    %58 = tpu.matmul %55, %57, %cst_10 {dimension_numbers = #tpu.dot_dimension_numbers<[1], [0], [0], [1], [0, 0, 1, 1], [], []>} : vector<4x128xbf16>, vector<128x128xbf16>, vector<4x128xf32> -> vector<4x128xf32>
    %c0_11 = arith.constant 0 : index
    %c1 = arith.constant 1 : index
    %c0_12 = arith.constant 0 : index
    %59 = vector.load %arg6[%c0_11, %c1, %c0_12] : memref<2x3x128xf32, #tpu.memory_space<vmem>>, vector<1x1x128xf32>
    %60 = vector.shape_cast %59 : vector<1x1x128xf32> to vector<1x128xf32>
    %61 = vector.broadcast %60 : vector<1x128xf32> to vector<4x128xf32>
    %62 = arith.addf %58, %61 : vector<4x128xf32>
    %cst_13 = arith.constant 0.000000e+00 : f32
    %63 = vector.broadcast %cst_13 : f32 to vector<4x128xf32>
    %64 = arith.maximumf %62, %63 : vector<4x128xf32>
    %65 = arith.truncf %64 : vector<4x128xf32> to vector<4x128xbf16>
    %c0_14 = arith.constant 0 : index
    %c1_15 = arith.constant 1 : index
    %c0_16 = arith.constant 0 : index
    %c0_17 = arith.constant 0 : index
    %66 = vector.load %arg4[%c0_14, %c1_15, %c0_16, %c0_17] : memref<2x2x128x128xbf16, #tpu.memory_space<vmem>>, vector<1x1x128x128xbf16>
    %67 = vector.shape_cast %66 : vector<1x1x128x128xbf16> to vector<128x128xbf16>
    %cst_18 = arith.constant dense<0.000000e+00> : vector<4x128xf32>
    %68 = tpu.matmul %65, %67, %cst_18 {dimension_numbers = #tpu.dot_dimension_numbers<[1], [0], [0], [1], [0, 0, 1, 1], [], []>} : vector<4x128xbf16>, vector<128x128xbf16>, vector<4x128xf32> -> vector<4x128xf32>
    %c0_19 = arith.constant 0 : index
    %c2 = arith.constant 2 : index
    %c0_20 = arith.constant 0 : index
    %69 = vector.load %arg6[%c0_19, %c2, %c0_20] : memref<2x3x128xf32, #tpu.memory_space<vmem>>, vector<1x1x128xf32>
    %70 = vector.shape_cast %69 : vector<1x1x128xf32> to vector<1x128xf32>
    %71 = vector.broadcast %70 : vector<1x128xf32> to vector<4x128xf32>
    %72 = arith.addf %68, %71 : vector<4x128xf32>
    %cst_21 = arith.constant 0.000000e+00 : f32
    %73 = vector.broadcast %cst_21 : f32 to vector<4x128xf32>
    %74 = arith.maximumf %72, %73 : vector<4x128xf32>
    %75 = arith.truncf %74 : vector<4x128xf32> to vector<4x128xbf16>
    %c0_22 = arith.constant 0 : index
    %c0_23 = arith.constant 0 : index
    %c0_24 = arith.constant 0 : index
    %76 = vector.load %arg5[%c0_22, %c0_23, %c0_24] : memref<2x128x128xbf16, #tpu.memory_space<vmem>>, vector<1x128x128xbf16>
    %77 = vector.shape_cast %76 : vector<1x128x128xbf16> to vector<128x128xbf16>
    %cst_25 = arith.constant dense<0.000000e+00> : vector<4x128xf32>
    %78 = tpu.matmul %75, %77, %cst_25 {dimension_numbers = #tpu.dot_dimension_numbers<[1], [0], [0], [1], [0, 0, 1, 1], [], []>} : vector<4x128xbf16>, vector<128x128xbf16>, vector<4x128xf32> -> vector<4x128xf32>
    %c0_26 = arith.constant 0 : index
    %c0_27 = arith.constant 0 : index
    %79 = vector.load %arg7[%c0_26, %c0_27] : memref<2x128xf32, #tpu.memory_space<vmem>>, vector<1x128xf32>
    %80 = vector.broadcast %79 : vector<1x128xf32> to vector<4x128xf32>
    %81 = arith.addf %78, %80 : vector<4x128xf32>
    %c0_28 = arith.constant 0 : index
    %c0_29 = arith.constant 0 : index
    %82 = vector.load %arg1[%c0_28, %c0_29] : memref<16x2xf32, #tpu.memory_space<vmem>>, vector<16x2xf32>
    %c1_30 = arith.constant 1 : index
    %c0_31 = arith.constant 0 : index
    %c0_32 = arith.constant 0 : index
    %83 = vector.load %arg6[%c1_30, %c0_31, %c0_32] : memref<2x3x128xf32, #tpu.memory_space<vmem>>, vector<1x1x128xf32>
    %84 = vector.shape_cast %83 : vector<1x1x128xf32> to vector<1x128xf32>
    %c0_33 = arith.constant 0 : index
    %c0_34 = arith.constant 0 : index
    %85 = vector.load %arg3[%c0_33, %c0_34] : memref<2x128xf32, #tpu.memory_space<vmem>>, vector<2x128xf32>
    %86 = vector.extract_strided_slice %82 {offsets = [0, 0], sizes = [16, 1], strides = [1, 1]} : vector<16x2xf32> to vector<16x1xf32>
    %87 = vector.extract_strided_slice %85 {offsets = [0, 0], sizes = [1, 128], strides = [1, 1]} : vector<2x128xf32> to vector<1x128xf32>
    %88 = vector.broadcast %86 : vector<16x1xf32> to vector<16x128xf32>
    %89 = vector.broadcast %87 : vector<1x128xf32> to vector<16x128xf32>
    %90 = arith.mulf %88, %89 : vector<16x128xf32>
    %91 = vector.extract_strided_slice %82 {offsets = [0, 1], sizes = [16, 1], strides = [1, 1]} : vector<16x2xf32> to vector<16x1xf32>
    %92 = vector.extract_strided_slice %85 {offsets = [1, 0], sizes = [1, 128], strides = [1, 1]} : vector<2x128xf32> to vector<1x128xf32>
    %93 = vector.broadcast %91 : vector<16x1xf32> to vector<16x128xf32>
    %94 = vector.broadcast %92 : vector<1x128xf32> to vector<16x128xf32>
    %95 = arith.mulf %93, %94 : vector<16x128xf32>
    %96 = arith.addf %90, %95 : vector<16x128xf32>
    %97 = vector.broadcast %84 : vector<1x128xf32> to vector<16x128xf32>
    %98 = arith.addf %96, %97 : vector<16x128xf32>
    %cst_35 = arith.constant 0.000000e+00 : f32
    %99 = vector.broadcast %cst_35 : f32 to vector<16x128xf32>
    %100 = arith.maximumf %98, %99 : vector<16x128xf32>
    %101 = arith.truncf %100 : vector<16x128xf32> to vector<16x128xbf16>
    %c1_36 = arith.constant 1 : index
    %c0_37 = arith.constant 0 : index
    %c0_38 = arith.constant 0 : index
    %c0_39 = arith.constant 0 : index
    %102 = vector.load %arg4[%c1_36, %c0_37, %c0_38, %c0_39] : memref<2x2x128x128xbf16, #tpu.memory_space<vmem>>, vector<1x1x128x128xbf16>
    %103 = vector.shape_cast %102 : vector<1x1x128x128xbf16> to vector<128x128xbf16>
    %cst_40 = arith.constant dense<0.000000e+00> : vector<16x128xf32>
    %104 = tpu.matmul %101, %103, %cst_40 {dimension_numbers = #tpu.dot_dimension_numbers<[1], [0], [0], [1], [0, 0, 1, 1], [], []>} : vector<16x128xbf16>, vector<128x128xbf16>, vector<16x128xf32> -> vector<16x128xf32>
    %c1_41 = arith.constant 1 : index
    %c1_42 = arith.constant 1 : index
    %c0_43 = arith.constant 0 : index
    %105 = vector.load %arg6[%c1_41, %c1_42, %c0_43] : memref<2x3x128xf32, #tpu.memory_space<vmem>>, vector<1x1x128xf32>
    %106 = vector.shape_cast %105 : vector<1x1x128xf32> to vector<1x128xf32>
    %107 = vector.broadcast %106 : vector<1x128xf32> to vector<16x128xf32>
    %108 = arith.addf %104, %107 : vector<16x128xf32>
    %cst_44 = arith.constant 0.000000e+00 : f32
    %109 = vector.broadcast %cst_44 : f32 to vector<16x128xf32>
    %110 = arith.maximumf %108, %109 : vector<16x128xf32>
    %111 = arith.truncf %110 : vector<16x128xf32> to vector<16x128xbf16>
    %c1_45 = arith.constant 1 : index
    %c1_46 = arith.constant 1 : index
    %c0_47 = arith.constant 0 : index
    %c0_48 = arith.constant 0 : index
    %112 = vector.load %arg4[%c1_45, %c1_46, %c0_47, %c0_48] : memref<2x2x128x128xbf16, #tpu.memory_space<vmem>>, vector<1x1x128x128xbf16>
    %113 = vector.shape_cast %112 : vector<1x1x128x128xbf16> to vector<128x128xbf16>
    %cst_49 = arith.constant dense<0.000000e+00> : vector<16x128xf32>
    %114 = tpu.matmul %111, %113, %cst_49 {dimension_numbers = #tpu.dot_dimension_numbers<[1], [0], [0], [1], [0, 0, 1, 1], [], []>} : vector<16x128xbf16>, vector<128x128xbf16>, vector<16x128xf32> -> vector<16x128xf32>
    %c1_50 = arith.constant 1 : index
    %c2_51 = arith.constant 2 : index
    %c0_52 = arith.constant 0 : index
    %115 = vector.load %arg6[%c1_50, %c2_51, %c0_52] : memref<2x3x128xf32, #tpu.memory_space<vmem>>, vector<1x1x128xf32>
    %116 = vector.shape_cast %115 : vector<1x1x128xf32> to vector<1x128xf32>
    %117 = vector.broadcast %116 : vector<1x128xf32> to vector<16x128xf32>
    %118 = arith.addf %114, %117 : vector<16x128xf32>
    %cst_53 = arith.constant 0.000000e+00 : f32
    %119 = vector.broadcast %cst_53 : f32 to vector<16x128xf32>
    %120 = arith.maximumf %118, %119 : vector<16x128xf32>
    %121 = arith.truncf %120 : vector<16x128xf32> to vector<16x128xbf16>
    %c1_54 = arith.constant 1 : index
    %c0_55 = arith.constant 0 : index
    %c0_56 = arith.constant 0 : index
    %122 = vector.load %arg5[%c1_54, %c0_55, %c0_56] : memref<2x128x128xbf16, #tpu.memory_space<vmem>>, vector<1x128x128xbf16>
    %123 = vector.shape_cast %122 : vector<1x128x128xbf16> to vector<128x128xbf16>
    %cst_57 = arith.constant dense<0.000000e+00> : vector<16x128xf32>
    %124 = tpu.matmul %121, %123, %cst_57 {dimension_numbers = #tpu.dot_dimension_numbers<[1], [0], [0], [1], [0, 0, 1, 1], [], []>} : vector<16x128xbf16>, vector<128x128xbf16>, vector<16x128xf32> -> vector<16x128xf32>
    %c1_58 = arith.constant 1 : index
    %c0_59 = arith.constant 0 : index
    %125 = vector.load %arg7[%c1_58, %c0_59] : memref<2x128xf32, #tpu.memory_space<vmem>>, vector<1x128xf32>
    %126 = vector.broadcast %125 : vector<1x128xf32> to vector<16x128xf32>
    %127 = arith.addf %124, %126 : vector<16x128xf32>
    %cst_60 = arith.constant dense<0.000000e+00> : vector<4x16xf32>
    %128 = tpu.matmul %81, %127, %cst_60 {dimension_numbers = #tpu.dot_dimension_numbers<[1], [1], [0], [0], [0, 0, 1, 0], [], []>} : vector<4x128xf32>, vector<16x128xf32>, vector<4x16xf32> -> vector<4x16xf32>
    %c0_61 = arith.constant 0 : index
    %c0_62 = arith.constant 0 : index
    %129 = vector.load %arg8[%c0_61, %c0_62] : memref<4x16xf32, #tpu.memory_space<vmem>>, vector<4x16xf32>
    tpu.vector_store %arg8[%c0_61, %c0_62], %128 {strides = array<i32>} : memref<4x16xf32, #tpu.memory_space<vmem>>, vector<4x16xf32>,
    return
  }
}

</mosaic_0001>

<bundles_post_ra>
// kernel: deeponet_forward.1
= control target key start
LH: loop header
LB: loop body
LE: loop exit
PB: predicated region body
PF: predicated region fallthrough
CT: control target
= control target key end

     0   :  { %13 = vsyncpa [#allocation3], 0  ;;  %s1564_s0 = inlined_call_operand.vmem [shape: f32[4,8], index: 0, kind: input, shape index: {}]   ;;  %s1565_s1 = inlined_call_operand.vmem [shape: f32[16,2], index: 1, kind: input, shape index: {}]   ;;  %s1566_s2 = inlined_call_operand.vmem [shape: f32[8,128], index: 2, kind: input, shape index: {}]   ;;  %s1567_s3 = inlined_call_operand.vmem [shape: f32[2,128], index: 3, kind: input, shape index: {}]   ;;  %s1568_s4 = inlined_call_operand.hbm [shape: bf16[2,2,128,128], index: 4, kind: input, shape index: {}]   ;;  %s1569_s5 = inlined_call_operand.hbm [shape: bf16[2,128,128], index: 5, kind: input, shape index: {}]   ;;  %s1570_s6 = inlined_call_operand.vmem [shape: f32[2,3,128], index: 6, kind: input, shape index: {}]   ;;  %s1571_s7 = inlined_call_operand.vmem [shape: f32[2,128], index: 7, kind: input, shape index: {}]   ;;  %s1572_s8 = inlined_call_operand.hbm [shape: f32[4,16], index: 8, kind: output, shape index: {}]  }
   0x1   :  { %14 = vsyncpa [#allocation6], 0 }
   0x2   :  { %15 = vsyncpa [#allocation4], 0  ;;  %s1348_s27 = smov [#allocation2]   ;;  %s1276_s9 = scalar_lea.hbm %s1568_s4, 4096 }
   0x3   :  { %s29_s28 = sshll.u32 %s1348_s27, 4  ;;  %p1277_p0 = scmp.ne.s32.totalorder %s1568_s4, %s1276_s9  ;;  %s30_s28 = int_to_ptr.vmem [resolvable:$true] %s29_s28 }
   0x4   :  { %p1280_p1 = scmp.lt.u32.totalorder %s1276_s9, %s1568_s4 }
   0x6   :  { %p1282_p2 = pnand %p1280_p1, %p1277_p0 }
   0x8   :  { %1285 = shalt.err (!%p1282_p2)
}
   0x9   :  { %s1286_s14 = scalar_lea.vmem %s30_s28, 4096  ;;  %p1291_p4 = scmp.lt.s32.totalorder %s30_s28, %s30_s28 }
   0xa   :  { %p1287_p3 = scmp.ne.s32.totalorder %s30_s28, %s1286_s14  ;;  %p1292_p5 = scmp.lt.s32.totalorder %s1286_s14, %s1286_s14 }
   0xc   :  { %p1293_p6 = por %p1292_p5, %p1291_p4 }
   0xe   :  { %p1294_p7 = pnand %p1293_p6, %p1287_p3 }
  0x10   :  { %1297 = shalt.err (!%p1294_p7)
}
  0x11   :  { %s1349_s15 = smov 64   ;;  %s1350_s16 = smov 4  }
  0x12   :  { %35 = dma.hbm_to_vmem [thread:$0]  %s1568_s4, 4096, %s30_s28, [#allocation3], %s1349_s15, %s1349_s15, %s1350_s16  }
  0x13   :  { %s1351_s19 = smov [#allocation5]   ;;  %s1298_s23 = scalar_lea.hbm %s1569_s5, 2048 }
  0x14   :  { %s41_s20 = sshll.u32 %s1351_s19, 4  ;;  %p1299_p8 = scmp.ne.s32.totalorder %s1569_s5, %s1298_s23  ;;  %s42_s20 = int_to_ptr.vmem [resolvable:$true] %s41_s20 }
  0x15   :  { %p1302_p9 = scmp.lt.u32.totalorder %s1298_s23, %s1569_s5 }
  0x17   :  { %p1304_p10 = pnand %p1302_p9, %p1299_p8 }
  0x19   :  { %1307 = shalt.err (!%p1304_p10)
}
  0x1a   :  { %s1308_s29 = scalar_lea.vmem %s42_s20, 2048  ;;  %p1313_p12 = scmp.lt.s32.totalorder %s42_s20, %s42_s20 }
  0x1b   :  { %p1309_p11 = scmp.ne.s32.totalorder %s42_s20, %s1308_s29  ;;  %p1314_p13 = scmp.lt.s32.totalorder %s1308_s29, %s1308_s29 }
  0x1d   :  { %p1315_p0 = por %p1314_p13, %p1313_p12 }
  0x1f   :  { %p1316_p1 = pnand %p1315_p0, %p1309_p11 }
  0x21   :  { %1319 = shalt.err (!%p1316_p1)
}
  0x22   :  { %47 = dma.hbm_to_vmem [thread:$0]  %s1569_s5, 2048, %s42_s20, [#allocation6], %s1349_s15, %s1349_s15, %s1350_s16  }
  0x23   :  { %1342 = dma.done.wait [#allocation3], 4096  }
  0x24   :  { %1343 = vsyncadd [#allocation3], 4294963200 }
  0x25   :  { %1344 = dma.done.wait [#allocation6], 2048  }
  0x26   :  { %1345 = vsyncadd [#allocation6], 4294965248  ;;  %v1352_v0 = vmov 2   ;;  %v1353_v1 = vmov 0   ;;  %v1354_v2 = vmov 0.0   ;;  %v1228_v4 = vld [vmem:[#allocation2] sm:$0xff]   ;;  %v67_v27 = vlaneseq }
  0x27   :  { %1218 = vset.pattern.permute.xlu1 %v1352_v0  ;;  %1216 = vset.pattern.permute.xlu0 %v1353_v1  ;;  %v59_v3 = vld [vmem:[%s1564_s0] sm:$0xf]  ;;  %v1229_v5 = vld [vmem:[#allocation2 + $0x8] sm:$0xff]   ;;  %v1355_v6 = vmov 3   ;;  %v1356_v7 = vmov 1   ;;  %v1230_v8 = vld [vmem:[#allocation2 + $0x10] sm:$0xff]  }
  0x28   :  { %1070 = vmatprep.subr.bf16.mxu0 %v1354_v2  ;;  %1090 = vmatprep.subr.bf16.mxu1 %v1354_v2  ;;  %v1357_v9 = vmov 4   ;;  %v1358_v10 = vmov 5   ;;  %v1231_v11 = vld [vmem:[#allocation2 + $0x18] sm:$0xff]   ;;  %v1232_v12 = vld [vmem:[#allocation2 + $0x20] sm:$0xff]   ;;  %v1359_v13 = vmov 6   ;;  %v1233_v14 = vld [vmem:[#allocation2 + $0x28] sm:$0xff]  }
  0x29   :  { %83 = vperm.xlu1 %1218, %v59_v3   ;;  %64 = vperm.xlu0 %1216, %v59_v3   ;;  %v1360_v15 = vmov 7   ;;  %v1234_v16 = vld [vmem:[#allocation2 + $0x30] sm:$0xff]   ;;  %v1235_v17 = vld [vmem:[#allocation2 + $0x38] sm:$0xff]   ;;  %vm1361_vm0 = vmmov 0   ;;  %v482_v18 = vld [vmem:[%s1565_s1 + $0x8] sm:$0xff]  ;;  %v1463_v28 = vshrl.u32 %v67_v27, 7 }
  0x2a   :  { %1071 = vmatpush3.bf16.msra.mxu0 %v1228_v4  ;;  %1086 = vmatprep.mubr.msk.bf16.mxu0 %vm1361_vm0, %v1354_v2  ;;  %v481_v19 = vld [vmem:[%s1565_s1] sm:$0xff]  ;;  %v1237_v21 = vld [vmem:[#allocation2 + $0x48] sm:$0xff]   ;;  %v1238_v22 = vld [vmem:[#allocation2 + $0x50] sm:$0xff]   ;;  %s1363_s29 = smov [#allocation7]   ;;  %vm936_vm1 = vcmask 125952  }
  0x2b   :  { %1072 = vmatprep.subr.bf16.mxu0 %v1354_v2  ;;  %1106 = vmatprep.mubr.msk.bf16.mxu1 %vm1361_vm0, %v1354_v2  ;;  %v1236_v20 = vld [vmem:[#allocation2 + $0x40] sm:$0xff]   ;;  %v1239_v23 = vld [vmem:[#allocation2 + $0x58] sm:$0xff]   ;;  %v1241_v25 = vld [vmem:[#allocation2 + $0x68] sm:$0xff]   ;;  %v69_v29 = vsub.s32 0, %v1463_v28  ;;  %v78_v30 = vsub.s32 1, %v1463_v28  ;;  %v88_v31 = vsub.s32 2, %v1463_v28 }
  0x2c   :  { %1091 = vmatpush3.bf16.msra.mxu1 %v1236_v20  ;;  %v1240_v24 = vld [vmem:[#allocation2 + $0x60] sm:$0xff]   ;;  %v1242_v26 = vld [vmem:[#allocation2 + $0x70] sm:$0xff]   ;;  %v98_v36 = vsub.s32 3, %v1463_v28  ;;  %v108_v38 = vsub.s32 4, %v1463_v28  ;;  %v118_v42 = vsub.s32 5, %v1463_v28  ;;  %v128_v50 = vsub.s32 6, %v1463_v28 }
  0x2d   :  { %1219 = vset.pattern.permute.xlu1 %v1355_v6  ;;  %1217 = vset.pattern.permute.xlu0 %v1356_v7  ;;  %v61_v34 = vld [vmem:[%s1566_s2] sm:$0xff]  ;;  %v138_v59 = vsub.s32 7, %v1463_v28  ;;  %v1246_v27 = vld [vmem:[#allocation2 + $0x90] sm:$0xff]   ;;  %s944_s4 = sshll.u32 %s1363_s29, 4  ;;  %s945_s4 = int_to_ptr.vmem [resolvable:$true] %s944_s4 }
  0x2e   :  { %93 = vperm.xlu1 %1219, %v59_v3   ;;  %73 = vperm.xlu0 %1217, %v59_v3   ;;  %v70_v35 = vrot.slane %v61_v34, %v69_v29  ;;  %v79_v37 = vrot.slane %v61_v34, %v78_v30  ;;  %v89_v39 = vrot.slane %v61_v34, %v88_v31  ;;  %v983_v28 = vld [vmem:[%s1570_s6 + $0x4] ss:$0 sm:$0xff]  ;;  %s1320_s28 = scalar_lea.vmem %s945_s4, 64  ;;  %p1325_p3 = scmp.lt.s32.totalorder %s945_s4, %s945_s4 }
  0x2f   :  { %1073 = vmatpush3.bf16.msra.mxu0 %v1229_v5  ;;  %1092 = vmatprep.subr.bf16.mxu1 %v1354_v2  ;;  %v99_v44 = vrot.slane %v61_v34, %v98_v36  ;;  %v109_v46 = vrot.slane %v61_v34, %v108_v38  ;;  %v119_v49 = vrot.slane %v61_v34, %v118_v42  ;;  %v954_v5 = vld [vmem:[%s1570_s6] ss:$0 sm:$0xff]  ;;  %p1321_p2 = scmp.ne.s32.totalorder %s945_s4, %s1320_s28  ;;  %p1326_p4 = scmp.lt.s32.totalorder %s1320_s28, %s1320_s28 }
  0x30   :  { %1074 = vmatprep.subr.bf16.mxu0 %v1354_v2  ;;  %1093 = vmatpush3.bf16.msra.mxu1 %v1237_v21  ;;  %v129_v58 = vrot.slane %v61_v34, %v128_v50  ;;  %v139_v0 = vrot.slane %v61_v34, %v138_v59  ;;  %v1247_v34 = vld [vmem:[#allocation2 + $0x98] sm:$0xff]  }
  0x31   :  { %1094 = vmatprep.subr.bf16.mxu1 %v1354_v2  ;;  %p1327_p5 = por %p1326_p4, %p1325_p3 }
  0x32   :  { %1220 = vset.pattern.permute.xlu1 %v1357_v9  ;;  %1221 = vset.pattern.permute.xlu0 %v1358_v10  ;;  %v1243_v10 = vld [vmem:[#allocation2 + $0x78] sm:$0xff]  }
  0x33   :  { %103 = vperm.xlu1 %1220, %v59_v3   ;;  %113 = vperm.xlu0 %1221, %v59_v3   ;;  %p1328_p6 = pnand %p1327_p5, %p1321_p2 }
  0x34   :  { %1075 = vmatpush3.bf16.msra.mxu0 %v1230_v8  ;;  %1095 = vmatpush3.bf16.msra.mxu1 %v1238_v22 }
  0x35   :  { %1076 = vmatprep.subr.bf16.mxu0 %v1354_v2  ;;  %1096 = vmatprep.subr.bf16.mxu1 %v1354_v2 }
  0x37   :  { %1222 = vset.pattern.permute.xlu1 %v1359_v13  ;;  %1224 = vset.pattern.permute.xlu0 %v1353_v1  ;;  %v1254_v13 = vld [vmem:[#allocation5 + $0x10] sm:$0xff]  }
  0x38   :  { %123 = vperm.xlu1 %1222, %v59_v3   ;;  %1077 = vmatpush3.bf16.msra.mxu0 %v1231_v11  ;;  %v1252_v11 = vld [vmem:[#allocation5] sm:$0xff]  }
  0x39   :  { %1078 = vmatprep.subr.bf16.mxu0 %v1354_v2  ;;  %488 = vperm.xlu0 %1224, %v481_v19  }
  0x3a   :  { %1097 = vmatpush3.bf16.msra.mxu1 %v1239_v23 }
  0x3b   :  { %1098 = vmatprep.subr.bf16.mxu1 %v1354_v2 }
  0x3c   :  { %1223 = vset.pattern.permute.xlu1 %v1360_v15  ;;  %1079 = vmatpush3.bf16.msra.mxu0 %v1232_v12  ;;  %v1253_v12 = vld [vmem:[#allocation5 + $0x8] sm:$0xff]   ;;  %v1256_v15 = vld [vmem:[#allocation5 + $0x20] sm:$0xff]  }
  0x3d   :  { %133 = vperm.xlu1 %1223, %v59_v3   ;;  %1080 = vmatprep.subr.bf16.mxu0 %v1354_v2 }
  0x3e   :  { %1227 = vset.pattern.permute.xlu0 %v1356_v7  ;;  %1099 = vmatpush3.bf16.msra.mxu1 %v1240_v24  ;;  %v1244_v24 = vld [vmem:[#allocation2 + $0x80] sm:$0xff]  }
  0x3f   :  { %507 = vperm.xlu0 %1227, %v482_v18   ;;  %1100 = vmatprep.subr.bf16.mxu1 %v1354_v2 }
  0x40   :  { %1081 = vmatpush3.bf16.msra.mxu0 %v1233_v14  ;;  %v1255_v14 = vld [vmem:[#allocation5 + $0x18] sm:$0xff]  }
  0x41   :  { %1082 = vmatprep.subr.bf16.mxu0 %v1354_v2  ;;  %1225 = vset.pattern.permute.xlu1 %v1353_v1 }
  0x42   :  { %493 = vperm.xlu1 %1225, %v482_v18   ;;  %1101 = vmatpush3.bf16.msra.mxu1 %v1241_v25 }
  0x43   :  { %1102 = vmatprep.subr.bf16.mxu1 %v1354_v2 }
  0x44   :  { %1083 = vmatpush3.bf16.msra.mxu0 %v1234_v16  ;;  %v1257_v16 = vld [vmem:[#allocation5 + $0x28] sm:$0xff]  }
  0x45   :  { %1084 = vmatprep.subr.bf16.mxu0 %v1354_v2 }
  0x46   :  { %1226 = vset.pattern.permute.xlu1 %v1356_v7  ;;  %1103 = vmatpush3.bf16.msra.mxu1 %v1242_v26  ;;  %v1245_v26 = vld [vmem:[#allocation2 + $0x88] sm:$0xff]  }
  0x47   :  { %503 = vperm.xlu1 %1226, %v481_v19   ;;  %1104 = vmatprep.subr.bf16.mxu1 %v1354_v2 }
  0x48   :  { %1085 = vmatpush3.bf16.msra.mxu0 %v1235_v17  ;;  %v955_v17 = vld [vmem:[%s1570_s6 + $0x1] ss:$0 sm:$0xff] }
  0x49   :  { %1110 = vmatprep.subr.bf16.mxu0 %v1354_v2 }
  0x4a   :  { %1105 = vmatpush3.bf16.msra.mxu1 %v1243_v10 }
  0x4b   :  { %1130 = vmatprep.subr.bf16.mxu1 %v1354_v2 }
  0xa8   :  { %v84_v32 = vpop.permute.xlu1 %83  ;;  %v65_v33 = vpop.permute.xlu0 %64 }
  0xa9   :  { %v71_v43 = vmul.f32 %v70_v35, %v65_v33  ;;  %v90_v47 = vmul.f32 %v89_v39, %v84_v32  ;;  %v485_v33 = vld [vmem:[%s1567_s3] sm:$0x3] }
  0xaa   :  { %v499_v35 = vrot.slane %v485_v33, %v69_v29  ;;  %v513_v36 = vrot.slane %v485_v33, %v78_v30  ;;  %v1248_v39 = vld [vmem:[#allocation2 + $0xa0] sm:$0xff]   ;;  %v1250_v29 = vld [vmem:[#allocation2 + $0xb0] sm:$0xff]  }
  0xad   :  { %v94_v40 = vpop.permute.xlu1 %93  ;;  %v74_v41 = vpop.permute.xlu0 %73 }
  0xae   :  { %v80_v45 = vmul.f32 %v79_v37, %v74_v41  ;;  %v100_v51 = vmul.f32 %v99_v44, %v94_v40  ;;  %v1249_v44 = vld [vmem:[#allocation2 + $0xa8] sm:$0xff]  }
  0xb0   :  { %v81_v48 = vadd.f32 %v80_v45, %v71_v43 }
  0xb2   :  { %v91_v52 = vadd.f32 %v90_v47, %v81_v48  ;;  %v104_v53 = vpop.permute.xlu1 %103  ;;  %v114_v54 = vpop.permute.xlu0 %113  ;;  %v1251_v48 = vld [vmem:[#allocation2 + $0xb8] sm:$0xff]  }
  0xb3   :  { %v110_v55 = vmul.f32 %v109_v46, %v104_v53  ;;  %v120_v57 = vmul.f32 %v119_v49, %v114_v54  ;;  %v1259_v53 = vld [vmem:[#allocation5 + $0x38] sm:$0xff]   ;;  %v964_v54 = vld [vmem:[%s1570_s6 + $0x2] ss:$0 sm:$0xff] }
  0xb4   :  { %v101_v56 = vadd.f32 %v100_v51, %v91_v52  ;;  %v1258_v52 = vld [vmem:[#allocation5 + $0x30] sm:$0xff]  }
  0xb6   :  { %v111_v60 = vadd.f32 %v110_v55, %v101_v56 }
  0xb7   :  { %v124_v61 = vpop.permute.xlu1 %123 }
  0xb8   :  { %v121_v62 = vadd.f32 %v120_v57, %v111_v60  ;;  %v130_v63 = vmul.f32 %v129_v58, %v124_v61  ;;  %v489_v32 = vpop.permute.xlu0 %488  ;;  %v1260_v61 = vld [vmem:[#allocation2 + $0xc0] sm:$0xff]  }
  0xb9   :  { %v500_v41 = vmul.f32 %v499_v35, %v489_v32  ;;  %v995_v32 = vld [vmem:[%s1570_s6 + $0x6] ss:$0 sm:$0xff] }
  0xba   :  { %v131_v3 = vadd.f32 %v130_v63, %v121_v62  ;;  %v1261_v63 = vld [vmem:[#allocation2 + $0xc8] sm:$0xff]  }
  0xbc   :  { %v134_v1 = vpop.permute.xlu1 %133 }
  0xbd   :  { %v140_v4 = vmul.f32 %v139_v0, %v134_v1  ;;  %v1262_v0 = vld [vmem:[#allocation2 + $0xd0] sm:$0xff]   ;;  %v1263_v1 = vld [vmem:[#allocation2 + $0xd8] sm:$0xff]  }
  0xbe   :  { %v508_v38 = vpop.permute.xlu0 %507 }
  0xbf   :  { %v141_v6 = vadd.f32 %v140_v4, %v131_v3  ;;  %v515_v43 = vmul.f32 %v513_v36, %v508_v38  ;;  %v1264_v3 = vld [vmem:[#allocation2 + $0xe0] sm:$0xff]   ;;  %v1265_v4 = vld [vmem:[#allocation2 + $0xe8] sm:$0xff]  }
  0xc1   :  { %v146_v7 = vadd.f32 %v954_v5, %v141_v6  ;;  %v494_v31 = vpop.permute.xlu1 %493  ;;  %v1266_v5 = vld [vmem:[#allocation2 + $0xf0] sm:$0xff]   ;;  %v985_v6 = vld [vmem:[%s1570_s6 + $0x5] ss:$0 sm:$0xff] }
  0xc2   :  { %v501_v40 = vmul.f32 %v499_v35, %v494_v31 }
  0xc3   :  { %v147_v8 = vmax.f32 %v146_v7, 0.0 }
  0xc4   :  { %v517_v46 = vadd.f32 %v515_v43, %v501_v40 }
  0xc5   :  { %v148_v9 = vpack.c.bf16 %v147_v8, %v147_v8  ;;  %v1267_v8 = vld [vmem:[#allocation2 + $0xf8] sm:$0xff]  }
  0xc6   :  { %v504_v37 = vpop.permute.xlu1 %503  ;;  %v523_v47 = vadd.f32 %v983_v28, %v517_v46 }
  0xc7   :  { %1087 = vmatmul.mubr.bf16.vlgmr.msra.gmra.mrb[0].mxu0 %v148_v9  ;;  %v514_v42 = vmul.f32 %v513_v36, %v504_v37 }
  0xc8   :  { %1126 = vmatprep.mubr.msk.bf16.mxu0 %vm1361_vm0, %v1354_v2  ;;  %1111 = vmatpush3.bf16.msra.mxu0 %v1252_v11  ;;  %v525_v50 = vmax.f32 %v523_v47, 0.0  ;;  %v973_v47 = vld [vmem:[%s1571_s7] ss:$0 sm:$0xff] }
  0xc9   :  { %1112 = vmatprep.subr.bf16.mxu0 %v1354_v2  ;;  %v516_v45 = vadd.f32 %v514_v42, %v500_v41  ;;  %v1004_v42 = vld [vmem:[%s1571_s7 + $0x1] ss:$0 sm:$0xff] }
  0xcb   :  { %v522_v30 = vadd.f32 %v983_v28, %v516_v45 }
  0xcc   :  { %1113 = vmatpush3.bf16.msra.mxu0 %v1253_v12 }
  0xcd   :  { %1114 = vmatprep.subr.bf16.mxu0 %v1354_v2  ;;  %v524_v49 = vmax.f32 %v522_v30, 0.0 }
  0xcf   :  { %v526_v51 = vpack.c.bf16 %v525_v50, %v524_v49 }
  0xd0   :  { %1115 = vmatpush3.bf16.msra.mxu0 %v1254_v13 }
  0xd1   :  { %1116 = vmatprep.subr.bf16.mxu0 %v1354_v2 }
  0xd4   :  { %1117 = vmatpush3.bf16.msra.mxu0 %v1255_v14 }
  0xd5   :  { %1118 = vmatprep.subr.bf16.mxu0 %v1354_v2 }
  0xd8   :  { %1119 = vmatpush3.bf16.msra.mxu0 %v1256_v15 }
  0xd9   :  { %1120 = vmatprep.subr.bf16.mxu0 %v1354_v2 }
  0xdc   :  { %1121 = vmatpush3.bf16.msra.mxu0 %v1257_v16 }
  0xdd   :  { %1122 = vmatprep.subr.bf16.mxu0 %v1354_v2 }
  0xe0   :  { %1123 = vmatpush3.bf16.msra.mxu0 %v1258_v52 }
  0xe1   :  { %1124 = vmatprep.subr.bf16.mxu0 %v1354_v2 }
  0xe4   :  { %1125 = vmatpush3.bf16.msra.mxu0 %v1259_v53 }
  0xe5   :  { %1150 = vmatprep.subr.bf16.mxu0 %v1354_v2 }
 0x19a   :  { %v252_v18 = vpop.f32.mrb[0].mxu0 }
 0x19b   :  { %v253_v19 = vadd.f32 %v955_v17, %v252_v18  ;;  %v1088_v20 = vpop.f32.mrb[1].mxu0  ;;  %v1268_v17 = vld [vmem:[#allocation5 + $0x40] sm:$0xff]   ;;  %v1269_v18 = vld [vmem:[#allocation5 + $0x48] sm:$0xff]  }
 0x19c   :  { %v255_v21 = vpop.f32.mrb[2].mxu0  ;;  %v1271_v20 = vld [vmem:[#allocation5 + $0x58] sm:$0xff]  }
 0x19d   :  { %v258_v22 = vmax.f32 %v253_v19, 0.0  ;;  %v1089_v23 = vpop.f32.mrb[3].mxu0  ;;  %v1270_v19 = vld [vmem:[#allocation5 + $0x50] sm:$0xff]   ;;  %v1272_v21 = vld [vmem:[#allocation5 + $0x60] sm:$0xff]  }
 0x19e   :  { %v1274_v23 = vld [vmem:[#allocation5 + $0x70] sm:$0xff]  }
 0x19f   :  { %v259_v25 = vpack.c.bf16 %v258_v22, %v258_v22  ;;  %v1273_v22 = vld [vmem:[#allocation5 + $0x68] sm:$0xff]  }
 0x1a1   :  { %1107 = vmatmul.mubr.bf16.vlgmr.msra.gmra.mrb[0].mxu1 %v259_v25 }
 0x1a2   :  { %1131 = vmatpush3.bf16.msra.mxu1 %v1244_v24  ;;  %1146 = vmatprep.mubr.msk.bf16.mxu1 %vm1361_vm0, %v1354_v2  ;;  %v1275_v24 = vld [vmem:[#allocation5 + $0x78] sm:$0xff]  }
 0x1a3   :  { %1132 = vmatprep.subr.bf16.mxu1 %v1354_v2 }
 0x1a6   :  { %1133 = vmatpush3.bf16.msra.mxu1 %v1245_v26 }
 0x1a7   :  { %1134 = vmatprep.subr.bf16.mxu1 %v1354_v2 }
 0x1aa   :  { %1135 = vmatpush3.bf16.msra.mxu1 %v1246_v27 }
 0x1ab   :  { %1136 = vmatprep.subr.bf16.mxu1 %v1354_v2 }
 0x1ae   :  { %1137 = vmatpush3.bf16.msra.mxu1 %v1247_v34 }
 0x1af   :  { %1138 = vmatprep.subr.bf16.mxu1 %v1354_v2 }
 0x1b2   :  { %1139 = vmatpush3.bf16.msra.mxu1 %v1248_v39 }
 0x1b3   :  { %1140 = vmatprep.subr.bf16.mxu1 %v1354_v2 }
 0x1b6   :  { %1141 = vmatpush3.bf16.msra.mxu1 %v1249_v44 }
 0x1b7   :  { %1142 = vmatprep.subr.bf16.mxu1 %v1354_v2 }
 0x1ba   :  { %1143 = vmatpush3.bf16.msra.mxu1 %v1250_v29 }
 0x1bb   :  { %1144 = vmatprep.subr.bf16.mxu1 %v1354_v2 }
 0x1be   :  { %1145 = vmatpush3.bf16.msra.mxu1 %v1251_v48 }
 0x1bf   :  { %1170 = vmatprep.subr.bf16.mxu1 %v1354_v2 }
 0x1c1   :  { %1147 = vmatmul.mubr.bf16.vlgmr.msra.gmra.mrb[4].mxu1 %v526_v51 }
 0x1c2   :  { %1186 = vmatprep.mubr.msk.bf16.mxu1 %vm1361_vm0, %v1354_v2  ;;  %1171 = vmatpush3.bf16.msra.mxu1 %v1268_v17 }
 0x1c3   :  { %1172 = vmatprep.subr.bf16.mxu1 %v1354_v2 }
 0x1c6   :  { %1173 = vmatpush3.bf16.msra.mxu1 %v1269_v18 }
 0x1c7   :  { %1174 = vmatprep.subr.bf16.mxu1 %v1354_v2 }
 0x1ca   :  { %1175 = vmatpush3.bf16.msra.mxu1 %v1270_v19 }
 0x1cb   :  { %1176 = vmatprep.subr.bf16.mxu1 %v1354_v2 }
 0x1ce   :  { %1177 = vmatpush3.bf16.msra.mxu1 %v1271_v20 }
 0x1cf   :  { %1178 = vmatprep.subr.bf16.mxu1 %v1354_v2 }
 0x1d2   :  { %1179 = vmatpush3.bf16.msra.mxu1 %v1272_v21 }
 0x1d3   :  { %1180 = vmatprep.subr.bf16.mxu1 %v1354_v2 }
 0x1d6   :  { %1181 = vmatpush3.bf16.msra.mxu1 %v1273_v22 }
 0x1d7   :  { %1182 = vmatprep.subr.bf16.mxu1 %v1354_v2 }
 0x1da   :  { %1183 = vmatpush3.bf16.msra.mxu1 %v1274_v23 }
 0x1db   :  { %1184 = vmatprep.subr.bf16.mxu1 %v1354_v2 }
 0x1de   :  { %1185 = vmatpush3.bf16.msra.mxu1 %v1275_v24 }
 0x274   :  { %v364_v55 = vpop.f32.mrb[0].mxu1 }
 0x275   :  { %v365_v56 = vadd.f32 %v964_v54, %v364_v55  ;;  %v1108_v57 = vpop.f32.mrb[1].mxu1 }
 0x276   :  { %v367_v58 = vpop.f32.mrb[2].mxu1 }
 0x277   :  { %v370_v59 = vmax.f32 %v365_v56, 0.0  ;;  %v1109_v60 = vpop.f32.mrb[3].mxu1 }
 0x279   :  { %v371_v62 = vpack.c.bf16 %v370_v59, %v370_v59 }
 0x27b   :  { %1127 = vmatmul.mubr.bf16.vlgmr.msra.gmra.mrb[4].mxu0 %v371_v62 }
 0x27c   :  { %1151 = vmatpush3.bf16.msra.mxu0 %v1260_v61  ;;  %1166 = vmatprep.mubr.msk.bf16.mxu0 %vm1361_vm0, %v1354_v2 }
 0x27d   :  { %1152 = vmatprep.subr.bf16.mxu0 %v1354_v2 }
 0x280   :  { %1153 = vmatpush3.bf16.msra.mxu0 %v1261_v63 }
 0x281   :  { %1154 = vmatprep.subr.bf16.mxu0 %v1354_v2 }
 0x284   :  { %1155 = vmatpush3.bf16.msra.mxu0 %v1262_v0 }
 0x285   :  { %1156 = vmatprep.subr.bf16.mxu0 %v1354_v2 }
 0x288   :  { %1157 = vmatpush3.bf16.msra.mxu0 %v1263_v1 }
 0x289   :  { %1158 = vmatprep.subr.bf16.mxu0 %v1354_v2 }
 0x28c   :  { %1159 = vmatpush3.bf16.msra.mxu0 %v1264_v3 }
 0x28d   :  { %1160 = vmatprep.subr.bf16.mxu0 %v1354_v2 }
 0x290   :  { %1161 = vmatpush3.bf16.msra.mxu0 %v1265_v4 }
 0x291   :  { %1162 = vmatprep.subr.bf16.mxu0 %v1354_v2 }
 0x294   :  { %v631_v7 = vpop.f32.mrb[4].mxu1  ;;  %1163 = vmatpush3.bf16.msra.mxu0 %v1266_v5 }
 0x295   :  { %v632_v9 = vadd.f32 %v985_v6, %v631_v7  ;;  %v1148_v10 = vpop.f32.mrb[5].mxu1  ;;  %1164 = vmatprep.subr.bf16.mxu0 %v1354_v2 }
 0x296   :  { %v634_v11 = vpop.f32.mrb[6].mxu1 }
 0x297   :  { %v635_v12 = vadd.f32 %v985_v6, %v634_v11  ;;  %v1149_v13 = vpop.f32.mrb[7].mxu1  ;;  %v638_v14 = vmax.f32 %v632_v9, 0.0 }
 0x298   :  { %1165 = vmatpush3.bf16.msra.mxu0 %v1267_v8 }
 0x299   :  { %v639_v15 = vmax.f32 %v635_v12, 0.0 }
 0x29b   :  { %v640_v16 = vpack.c.bf16 %v639_v15, %v638_v14 }
 0x29d   :  { %1167 = vmatmul.mubr.bf16.vlgmr.msra.gmra.mrb[8].mxu0 %v640_v16 }
 0x29e   :  { %1194 = vmatprep.mubr.msk.f32.mxu0 %vm1361_vm0, %v1354_v2  ;;  %v1362_v2 = vmov 0.0|0.0  }
 0x29f   :  { %1197 = vmatprep.subr.bf16.mxu0 %v1362_v2 }
 0x34e   :  { %v475_v25 = vpop.f32.mrb[4].mxu0 }
 0x34f   :  { %v1128_v26 = vpop.f32.mrb[5].mxu0  ;;  %v476_v48 = vadd.f32 %v973_v47, %v475_v25 }
 0x350   :  { %v478_v27 = vpop.f32.mrb[6].mxu0 }
 0x351   :  { %v1129_v31 = vpop.f32.mrb[7].mxu0 }
 0x370   :  { %v745_v33 = vpop.f32.mrb[8].mxu0 }
 0x371   :  { %v746_v34 = vadd.f32 %v995_v32, %v745_v33  ;;  %v1168_v35 = vpop.f32.mrb[9].mxu0 }
 0x372   :  { %v748_v36 = vpop.f32.mrb[10].mxu0 }
 0x373   :  { %v749_v37 = vadd.f32 %v995_v32, %v748_v36  ;;  %v1169_v38 = vpop.f32.mrb[11].mxu0  ;;  %v752_v39 = vmax.f32 %v746_v34, 0.0 }
 0x375   :  { %v753_v40 = vmax.f32 %v749_v37, 0.0 }
 0x377   :  { %v754_v41 = vpack.c.bf16 %v753_v40, %v752_v39 }
 0x379   :  { %1187 = vmatmul.mubr.bf16.vlgmr.msra.gmra.mrb[8].mxu1 %v754_v41 }
 0x44c   :  { %v859_v43 = vpop.f32.mrb[8].mxu1 }
 0x44d   :  { %v1188_v44 = vpop.f32.mrb[9].mxu1  ;;  %v860_v46 = vadd.f32 %v1004_v42, %v859_v43 }
 0x44e   :  { %v862_v45 = vpop.f32.mrb[10].mxu1 }
 0x44f   :  { %v863_v28 = vadd.f32 %v1004_v42, %v862_v45  ;;  %v1189_v29 = vpop.f32.mrb[11].mxu1 }
 0x451   :  { %v1198_v30 = vpack.c.bf16 %v863_v28, %v860_v46 }
 0x453   :  { %1199 = vmatpush3.bf16.xpose.msra.mxu0 %v1198_v30 }
 0x45a   :  { %1195 = vmatmul.mubr.f32.vlgmr.msra.gmra.mrb[12].mxu0 %v476_v48 }
 0x52d   :  { %v932_v49 = vpop.f32.mrb[12].mxu0 }
 0x52e   :  { %v1196_v50 = vpop.f32.mrb[13].mxu0  ;;  %937 = vst.msk [vmem:[#allocation7] sm:$0xf] %vm936_vm1, %v932_v49 }
 0x52f   :  { %1331 = shalt.err (!%p1328_p6)
}
 0x530   :  { %s1332_s7 = scalar_lea.hbm %s1572_s8, 64 }
 0x531   :  { %p1333_p7 = scmp.ne.s32.totalorder %s1572_s8, %s1332_s7  ;;  %p1336_p8 = scmp.lt.u32.totalorder %s1332_s7, %s1572_s8 }
 0x533   :  { %p1338_p9 = pnand %p1336_p8, %p1333_p7 }
 0x535   :  { %1341 = shalt.err (!%p1338_p9)
}
 0x536   :  { %947 = dma.vmem_to_hbm [thread:$0]  %s945_s4, 64, %s1572_s8, [#allocation4]  }
 0x537   :  { %1346 = dma.done.wait [#allocation4], 64  }
 0x538   :  { %1347 = vsyncadd [#allocation4], 4294967232 }
 0x539   :  { %951 = vsyncpa [#allocation3], 1 }
 0x53a   :  { %952 = vsyncpa [#allocation6], 1 }
 0x53b   :  { %953 = vsyncpa [#allocation4], 1 }

</bundles_post_ra>
